<compile_context>
chip_gen: v5e
topology: v5e:2x2
jax: 0.10.0
libtpu: 0.0.40
codegen_flags: <defaults>
</compile_context>

<pallas_src>
import jax
import jax.numpy as jnp
from jax.experimental import pallas as pl
from jax.experimental.pallas import tpu as pltpu


def valuenet_kernel(x_ref, w1_ref, b1_ref, w2_ref, b2_ref, out_ref):
    # x_ref:  (S, TB)   batch tile, batch on lanes
    # w1_ref: (H, S)    resident fc1 weight
    # b1_ref: (H, 1)    resident fc1 bias (broadcast over lanes)
    # w2_ref: (H, 1)    resident fc2 weight (column)
    # b2_ref: (1, 1)    fc2 bias in SMEM (scalar)
    # out_ref:(1, TB)   lane-dense output tile
    h = jnp.dot(w1_ref[...], x_ref[...], preferred_element_type=jnp.float32)  # (H, TB)
    h = jnp.maximum(h + b1_ref[...], 0.0)
    # fc2 as VPU broadcast-multiply + cross-sublane reduce (avoids N=1 MXU matmul).
    v = jnp.sum(h * w2_ref[...], axis=0, keepdims=True)                       # (1, TB)
    out_ref[...] = (v + b2_ref[0, 0]).astype(out_ref.dtype)


def _round_up(x, m):
    return ((x + m - 1) // m) * m


def value_net_forward(state, fc1_w, fc1_b, fc2_w, fc2_b, *, block_b=512):
    """state: (B, state_dim) f32. Params in torch nn.Linear layout:
       fc1_w (H, S), fc1_b (H,), fc2_w (1, H), fc2_b (1,). Returns (B, 1) f32."""
    B, S = state.shape
    H = fc1_w.shape[0]

    # Batch tile: multiple of 128 lanes, capped at block_b; pad B up to a tile multiple.
    tb = max(128, _round_up(min(block_b, _round_up(B, 128)), 128))
    num_tiles = pl.cdiv(B, tb)
    b_pad = num_tiles * tb

    # Transpose so batch lands on lanes; zero-pad the ragged tail.
    x_t = jnp.pad(state.T, ((0, 0), (0, b_pad - B)))          # (S, B_pad)
    b1_col = fc1_b.reshape(H, 1)
    w2_col = fc2_w.reshape(H, 1)
    b2_2d = fc2_b.reshape(1, 1)

    out_t = pl.pallas_call(
        valuenet_kernel,
        out_shape=jax.ShapeDtypeStruct((1, b_pad), jnp.float32),
        grid=(num_tiles,),
        in_specs=[
            pl.BlockSpec((S, tb), lambda i: (0, i)),           # state tile (batch on lanes)
            pl.BlockSpec((H, S), lambda i: (0, 0)),            # fc1 weight, VMEM-resident
            pl.BlockSpec((H, 1), lambda i: (0, 0)),            # fc1 bias,   VMEM-resident
            pl.BlockSpec((H, 1), lambda i: (0, 0)),            # fc2 weight, VMEM-resident
            pl.BlockSpec(memory_space=pltpu.MemorySpace.SMEM), # fc2 bias scalar in SMEM
        ],
        out_specs=pl.BlockSpec((1, tb), lambda i: (0, i)),     # lane-dense output tile
        compiler_params=pltpu.CompilerParams(
            dimension_semantics=("parallel",),                 # shard batch across cores
            vmem_limit_bytes=32 * 1024 * 1024,
        ),
    )(x_t, fc1_w, b1_col, w2_col, b2_2d)

    return out_t[0, :B].reshape(B, 1)


def init_params(key, state_dim, hidden_dim):
    """Deterministic init mirroring torch.nn.Linear default U[-1/sqrt(fan_in), 1/sqrt(fan_in)],
    stored in torch layout: fc1_w (H, S), fc1_b (H,), fc2_w (1, H), fc2_b (1,)."""
    k1, k2, k3, k4 = jax.random.split(key, 4)
    bound1 = 1.0 / jnp.sqrt(jnp.float32(state_dim))
    bound2 = 1.0 / jnp.sqrt(jnp.float32(hidden_dim))
    fc1_w = jax.random.uniform(k1, (hidden_dim, state_dim), jnp.float32, -bound1, bound1)
    fc1_b = jax.random.uniform(k2, (hidden_dim,), jnp.float32, -bound1, bound1)
    fc2_w = jax.random.uniform(k3, (1, hidden_dim), jnp.float32, -bound2, bound2)
    fc2_b = jax.random.uniform(k4, (1,), jnp.float32, -bound2, bound2)
    return fc1_w, fc1_b, fc2_w, fc2_b


def _reference(state, fc1_w, fc1_b, fc2_w, fc2_b):
    return jnp.maximum(state @ fc1_w.T + fc1_b[None, :], 0.0) @ fc2_w.T + fc2_b[None, :]


if __name__ == "__main__":
    key = jax.random.PRNGKey(0)
    k_params, k_state = jax.random.split(key)

    batch = 8
    state_dim = 4
    hidden_dim = 32

    fc1_w, fc1_b, fc2_w, fc2_b = init_params(k_params, state_dim, hidden_dim)
    state = jax.random.normal(k_state, (batch, state_dim), dtype=jnp.float32)

    # Small-batch path (single padded tile).
    out = jax.block_until_ready(value_net_forward(state, fc1_w, fc1_b, fc2_w, fc2_b))
    ref = _reference(state, fc1_w, fc1_b, fc2_w, fc2_b)
    assert out.shape == (batch, 1)
    assert jnp.allclose(out, ref, atol=1e-5, rtol=1e-5)

    # Multi-tile grid path with a ragged tail (exercises the batch grid + padding).
    big_batch = 300
    state_big = jax.random.normal(jax.random.PRNGKey(1), (big_batch, state_dim), jnp.float32)
    out_big = jax.block_until_ready(
        value_net_forward(state_big, fc1_w, fc1_b, fc2_w, fc2_b, block_b=128))
    ref_big = _reference(state_big, fc1_w, fc1_b, fc2_w, fc2_b)
    assert out_big.shape == (big_batch, 1)
    assert jnp.allclose(out_big, ref_big, atol=1e-5, rtol=1e-5)

    print("KERNEL_OK")
</pallas_src>

<mosaic_0001>
module attributes {stable_mosaic.version = 11 : i64} {
  func.func @valuenet_kernel(%arg0: i32, %arg1: memref<4x128xf32, #tpu.memory_space<vmem>>, %arg2: memref<32x4xf32, #tpu.memory_space<vmem>>, %arg3: memref<32x1xf32, #tpu.memory_space<vmem>>, %arg4: memref<32x1xf32, #tpu.memory_space<vmem>>, %arg5: memref<1x1xf32, #tpu.memory_space<smem>>, %arg6: memref<1x128xf32, #tpu.memory_space<vmem>>) attributes {dimension_semantics = [#tpu.dimension_semantics<parallel>], iteration_bounds = array<i64: 1>, scalar_prefetch = 0 : i64, scratch_operands = 0 : i64, tpu.core_type = #tpu.core_type<tc>, window_params = [{transform_indices = @transform_0, window_bounds = array<i64: 4, 128>}, {pipeline_mode = #tpu.pipeline_mode<synchronous>, transform_indices = @transform_1, window_bounds = array<i64: 32, 4>}, {pipeline_mode = #tpu.pipeline_mode<synchronous>, transform_indices = @transform_2, window_bounds = array<i64: 32, 1>}, {pipeline_mode = #tpu.pipeline_mode<synchronous>, transform_indices = @transform_3, window_bounds = array<i64: 32, 1>}, {transform_indices = @transform_4, window_bounds = array<i64: 1, 1>}, {transform_indices = @transform_5, window_bounds = array<i64: 1, 128>}]} {
    %c0 = arith.constant 0 : index
    %c0_0 = arith.constant 0 : index
    %0 = vector.load %arg2[%c0, %c0_0] : memref<32x4xf32, #tpu.memory_space<vmem>>, vector<32x4xf32>
    %c0_1 = arith.constant 0 : index
    %c0_2 = arith.constant 0 : index
    %1 = vector.load %arg1[%c0_1, %c0_2] : memref<4x128xf32, #tpu.memory_space<vmem>>, vector<4x128xf32>
    %cst = arith.constant dense<0.000000e+00> : vector<32x128xf32>
    %2 = tpu.matmul %0, %1, %cst {dimension_numbers = #tpu.dot_dimension_numbers<[1], [0], [0], [1], [0, 0, 1, 1], [], []>} : vector<32x4xf32>, vector<4x128xf32>, vector<32x128xf32> -> vector<32x128xf32>
    %c0_3 = arith.constant 0 : index
    %c0_4 = arith.constant 0 : index
    %3 = vector.load %arg3[%c0_3, %c0_4] : memref<32x1xf32, #tpu.memory_space<vmem>>, vector<32x1xf32>
    %4 = vector.broadcast %3 : vector<32x1xf32> to vector<32x128xf32>
    %5 = arith.addf %2, %4 : vector<32x128xf32>
    %cst_5 = arith.constant 0.000000e+00 : f32
    %6 = vector.broadcast %cst_5 : f32 to vector<32x128xf32>
    %7 = arith.maximumf %5, %6 : vector<32x128xf32>
    %c0_6 = arith.constant 0 : index
    %c0_7 = arith.constant 0 : index
    %8 = vector.load %arg4[%c0_6, %c0_7] : memref<32x1xf32, #tpu.memory_space<vmem>>, vector<32x1xf32>
    %9 = vector.broadcast %8 : vector<32x1xf32> to vector<32x128xf32>
    %10 = arith.mulf %7, %9 : vector<32x128xf32>
    %cst_8 = arith.constant dense<0.000000e+00> : vector<128xf32>
    %11 = vector.multi_reduction <add>, %10, %cst_8 [0] : vector<32x128xf32> to vector<128xf32>
    %12 = vector.shape_cast %11 : vector<128xf32> to vector<1x128xf32>
    %c0_9 = arith.constant 0 : index
    %c0_10 = arith.constant 0 : index
    %13 = memref.load %arg5[%c0_9, %c0_10] : memref<1x1xf32, #tpu.memory_space<smem>>
    %14 = vector.broadcast %13 : f32 to vector<1x128xf32>
    %15 = arith.addf %12, %14 : vector<1x128xf32>
    %c0_11 = arith.constant 0 : index
    %c0_12 = arith.constant 0 : index
    %16 = vector.load %arg6[%c0_11, %c0_12] : memref<1x128xf32, #tpu.memory_space<vmem>>, vector<1x128xf32>
    tpu.vector_store %arg6[%c0_11, %c0_12], %15 {strides = array<i32>} : memref<1x128xf32, #tpu.memory_space<vmem>>, vector<1x128xf32>,
    return
  }
  func.func @transform_0(%arg0: i32) -> (i32, i32) {
    %c0_i32 = arith.constant 0 : i32
    %c0_i32_0 = arith.constant 0 : i32
    return %c0_i32, %arg0 : i32, i32
  }
  func.func @transform_1(%arg0: i32) -> (i32, i32) {
    %c0_i32 = arith.constant 0 : i32
    %c0_i32_0 = arith.constant 0 : i32
    %c0_i32_1 = arith.constant 0 : i32
    return %c0_i32, %c0_i32_0 : i32, i32
  }
  func.func @transform_2(%arg0: i32) -> (i32, i32) {
    %c0_i32 = arith.constant 0 : i32
    %c0_i32_0 = arith.constant 0 : i32
    %c0_i32_1 = arith.constant 0 : i32
    return %c0_i32, %c0_i32_0 : i32, i32
  }
  func.func @transform_3(%arg0: i32) -> (i32, i32) {
    %c0_i32 = arith.constant 0 : i32
    %c0_i32_0 = arith.constant 0 : i32
    %c0_i32_1 = arith.constant 0 : i32
    return %c0_i32, %c0_i32_0 : i32, i32
  }
  func.func @transform_4(%arg0: i32) -> (i32, i32) {
    %c0_i32 = arith.constant 0 : i32
    %c0_i32_0 = arith.constant 0 : i32
    %c0_i32_1 = arith.constant 0 : i32
    return %c0_i32, %c0_i32_0 : i32, i32
  }
  func.func @transform_5(%arg0: i32) -> (i32, i32) {
    %c0_i32 = arith.constant 0 : i32
    %c0_i32_0 = arith.constant 0 : i32
    return %c0_i32, %arg0 : i32, i32
  }
}

</mosaic_0001>

<bundles_post_ra>
// kernel: tpu_custom_call.1
= control target key start
LH: loop header
LB: loop body
LE: loop exit
PB: predicated region body
PF: predicated region fallthrough
CT: control target
= control target key end

     0   :  { %vm64_vm0 = vcmask 1043456   ;;  %v197_v1 = vmov 0   ;;  %vm51_vm1 = vcmask 31744   ;;  %s274_s0 = inlined_call_operand.vmem [shape: f32[4,128], index: 0, kind: input, shape index: {}]   ;;  %s275_s1 = inlined_call_operand.vmem [shape: f32[32,4], index: 1, kind: input, shape index: {}]   ;;  %s276_s2 = inlined_call_operand.vmem [shape: f32[32,1], index: 2, kind: input, shape index: {}]   ;;  %s277_s3 = inlined_call_operand.vmem [shape: f32[32,1], index: 3, kind: input, shape index: {}]   ;;  %s278_s4 = inlined_call_operand.<no memory space> [shape: f32[1,1], index: 4, kind: input, shape index: {}]   ;;  %s279_s5 = inlined_call_operand.hbm [shape: f32[1,128], index: 5, kind: output, shape index: {}]  }
   0x1   :  { %v26_v0 = vld [vmem:[%s274_s0] sm:$0xf]  ;;  %169 = vset.pattern.permute.xlu1 %v197_v1  ;;  %168 = vset.pattern.permute.xlu0 %v197_v1  ;;  %v29_v2 = vld [vmem:[%s276_s2 + $0x10] sm:$0xff]  ;;  %v23_v5 = vld [vmem:[%s275_s1 + $0x8] sm:$0xff] }
   0x2   :  { %v27_v3 = vld [vmem:[%s276_s2] sm:$0xff]  ;;  %158 = vmatpush.msk.msra.mxu0 %vm64_vm0, %v26_v0  ;;  %163 = vmatpush.msk.msra.mxu1 %vm64_vm0, %v26_v0  ;;  %v24_v6 = vld [vmem:[%s275_s1 + $0x10] sm:$0xff]  ;;  %v25_v7 = vld [vmem:[%s275_s1 + $0x18] sm:$0xff] }
   0x3   :  { %v22_v4 = vld [vmem:[%s275_s1] sm:$0xff]  ;;  %164 = vmatpush.msk.msra.mxu2 %vm64_vm0, %v26_v0  ;;  %165 = vmatpush.msk.msra.mxu3 %vm64_vm0, %v26_v0 }
   0x4   :  { %43 = vperm.xlu1 %169, %v29_v2   ;;  %33 = vperm.xlu0 %168, %v27_v3  }
   0x5   :  { %11 = vsyncpa [#allocation4], 0  ;;  %159 = vmatmul.msk.f32.vlgmr.msra.gmra.mxu0 %vm51_vm1, %v22_v4  ;;  %160 = vmatmul.msk.f32.vlgmr.msra.gmra.mxu1 %vm51_vm1, %v23_v5  ;;  %v101_v8 = vld [vmem:[%s277_s3] sm:$0xff]  ;;  %v30_v9 = vld [vmem:[%s276_s2 + $0x18] sm:$0xff]  ;;  %v139_v46 = vstv %s278_s4  ;;  %s198_s17 = smov [#allocation3]   ;;  %s149_s21 = sshll.u32 %s279_s5, 4  ;;  %s150_s21 = int_to_ptr.hbm [resolvable:$true] %s149_s21 }
   0x6   :  { %161 = vmatmul.msk.f32.vlgmr.msra.gmra.mxu2 %vm51_vm1, %v24_v6  ;;  %162 = vmatmul.msk.f32.vlgmr.msra.gmra.mxu3 %vm51_vm1, %v25_v7  ;;  %v28_v10 = vld [vmem:[%s276_s2 + $0x8] sm:$0xff]  ;;  %v104_v12 = vld [vmem:[%s277_s3 + $0x18] sm:$0xff]  ;;  %v103_v13 = vld [vmem:[%s277_s3 + $0x10] sm:$0xff]  ;;  %s147_s18 = sshll.u32 %s198_s17, 4  ;;  %s148_s18 = int_to_ptr.vmem [resolvable:$true] %s147_s18 }
   0x7   :  { %170 = vset.pattern.permute.xlu2 %v197_v1  ;;  %v102_v11 = vld [vmem:[%s277_s3 + $0x8] sm:$0xff] }
   0x8   :  { %107 = vperm.xlu2 %170, %v101_v8  }
   0xc   :  { %48 = vperm.xlu1 %169, %v30_v9   ;;  %38 = vperm.xlu0 %168, %v28_v10  }
  0x10   :  { %112 = vperm.xlu2 %170, %v102_v11  }
  0x14   :  { %122 = vperm.xlu1 %169, %v104_v12   ;;  %117 = vperm.xlu0 %168, %v103_v13  }
  0x62   :  { %v108_v16 = vpop.permute.xlu2 %107 }
  0x6a   :  { %v113_v25 = vpop.permute.xlu2 %112 }
  0x76   :  { %v34_v14 = vpop.permute.xlu0 %33  ;;  %v44_v15 = vpop.permute.xlu1 %43 }
  0x7e   :  { %v39_v17 = vpop.permute.xlu0 %38  ;;  %v49_v22 = vpop.permute.xlu1 %48 }
  0x82   :  { %v85_v18 = vpop.f32.mrf.mxu0  ;;  %v88_v19 = vpop.f32.mrf.mxu1 }
  0x83   :  { %v86_v20 = vadd.f32 %v85_v18, %v34_v14  ;;  %v89_v21 = vadd.f32 %v88_v19, %v39_v17 }
  0x85   :  { %v97_v23 = vmax.f32 %v86_v20, 0.0  ;;  %v98_v24 = vmax.f32 %v89_v21, 0.0 }
  0x86   :  { %v118_v34 = vpop.permute.xlu0 %117  ;;  %v123_v37 = vpop.permute.xlu1 %122 }
  0x87   :  { %v125_v28 = vmul.f32 %v108_v16, %v97_v23  ;;  %v126_v29 = vmul.f32 %v113_v25, %v98_v24 }
  0x89   :  { %v91_v26 = vpop.f32.mrf.mxu2  ;;  %v94_v27 = vpop.f32.mrf.mxu3  ;;  %v129_v35 = vadd.f32 %v126_v29, %v125_v28 }
  0x8a   :  { %v92_v30 = vadd.f32 %v91_v26, %v44_v15  ;;  %v95_v31 = vadd.f32 %v94_v27, %v49_v22 }
  0x8c   :  { %v99_v32 = vmax.f32 %v92_v30, 0.0  ;;  %v100_v33 = vmax.f32 %v95_v31, 0.0 }
  0x8e   :  { %v127_v36 = vmul.f32 %v118_v34, %v99_v32  ;;  %v128_v39 = vmul.f32 %v123_v37, %v100_v33 }
  0x90   :  { %v130_v38 = vadd.f32 %v129_v35, %v127_v36 }
  0x92   :  { %v131_v40 = vadd.f32 %v130_v38, %v128_v39 }
  0x94   :  { %v132_v41 = vrot.slane %v131_v40, 4 }
  0x96   :  { %v133_v42 = vadd.f32 %v132_v41, %v131_v40 }
  0x98   :  { %v134_v43 = vrot.slane %v133_v42, 2 }
  0x9a   :  { %v135_v44 = vadd.f32 %v134_v43, %v133_v42 }
  0x9c   :  { %v136_v45 = vrot.slane %v135_v44, 1 }
  0x9e   :  { %v137_v47 = vadd.f32 %v136_v45, %v135_v44 }
  0xa0   :  { %v140_v48 = vadd.f32 %v139_v46, %v137_v47 }
  0xa2   :  { %141 = vst [vmem:[#allocation3] sm:$0x1] %v140_v48 }
  0xa3   :  { %152 = dma.vmem_to_hbm [thread:$0]  %s148_s18, 16, %s150_s21, [#allocation4]  }
  0xa4   :  { %195 = dma.done.wait [#allocation4], 16  }
  0xa5   :  { %196 = vsyncadd [#allocation4], 4294967280 }
  0xa6   :  { %157 = vsyncpa [#allocation4], 1 }

</bundles_post_ra>
